<compile_context>
chip_gen: v5e
topology: v5e:2x2
jax: 0.10.0
libtpu: 0.0.40
codegen_flags: <defaults>
</compile_context>

<pallas_src>
import jax
import jax.numpy as jnp
from jax.experimental import pallas as pl
from jax.experimental.pallas import tpu as pltpu


def _bat_linear_plain_kernel(x_ref, w_ref, u_ref, o_ref, acc_ref):
    """mask == 0 fast path: out = x @ (W + U)^T, no stochastic quantization."""
    k = pl.program_id(1)

    @pl.when(k == 0)
    def _init():
        acc_ref[...] = jnp.zeros_like(acc_ref)

    tk = w_ref.shape[0]
    w_eff = (w_ref[...] + u_ref[...]).astype(jnp.bfloat16)        # (tk, tn)
    xs = x_ref[:, pl.ds(k * tk, tk)].astype(jnp.bfloat16)          # (B, tk)
    acc_ref[...] += jnp.dot(xs, w_eff, preferred_element_type=jnp.float32)

    @pl.when(k == pl.num_programs(1) - 1)
    def _flush():
        o_ref[...] = acc_ref[...].astype(o_ref.dtype)


def _bat_linear_quant_kernel(scalars_ref, x_ref, w_ref, u_ref, r_ref, o_ref, acc_ref):
    """Stochastic binarized-update path (mask != 0)."""
    k = pl.program_id(1)

    @pl.when(k == 0)
    def _init():
        acc_ref[...] = jnp.zeros_like(acc_ref)

    # scalars (SMEM f32[3]): [alpha, 0.5/alpha, mask]  (alpha pre-clamped on host)
    alpha = scalars_ref[0]
    inv2a = scalars_ref[1]
    mask = scalars_ref[2]

    u = u_ref[...]                                                 # (tk, tn) f32
    rnd = r_ref[...]                                               # (tk, tn) f32 in [0,1)

    # floor(0.5*(u/alpha + 1) + rand) == floor(u*(0.5/alpha) + (rand + 0.5))
    x_int = jnp.clip(jnp.floor(u * inv2a + (rnd + 0.5)), 0.0, 1.0)
    u_q = (2.0 * x_int - 1.0) * alpha
    u_eff = u_q * mask + u * (1.0 - mask)

    tk = w_ref.shape[0]
    w_eff = (w_ref[...] + u_eff).astype(jnp.bfloat16)
    xs = x_ref[:, pl.ds(k * tk, tk)].astype(jnp.bfloat16)
    acc_ref[...] += jnp.dot(xs, w_eff, preferred_element_type=jnp.float32)

    @pl.when(k == pl.num_programs(1) - 1)
    def _flush():
        o_ref[...] = acc_ref[...].astype(o_ref.dtype)


def bat_linear_forward(x, weight, update, alpha0, rho, alpha_param, mask,
                       *, key=None, rand=None, tn=256, tk=512):
    """x: (B, K) f32; weight/update: (N, K) f32 (PyTorch layout). Returns (B, N) f32.

    `mask` must be a static Python float (it is a module buffer in PyTorch).
    """
    B, K = x.shape
    N, K2 = weight.shape
    assert K == K2 and update.shape == weight.shape

    # (K, N) layout: contraction on the leading dim of the RHS feeds the MXU
    # directly (no hidden transpose) and keeps the output lane-dense.
    wT = weight.T
    uT = update.T

    tn = min(tn, N)
    tk = min(tk, K)
    assert N % tn == 0 and K % tk == 0, "N/K must be divisible by tile sizes"
    assert tn == N or tn % 128 == 0
    assert tk == K or tk % 128 == 0
    grid = (N // tn, K // tk)

    x_spec = pl.BlockSpec((B, K), lambda n, k: (0, 0))     # fully resident in VMEM
    wk_spec = pl.BlockSpec((tk, tn), lambda n, k: (k, n))  # streamed tiles
    out_spec = pl.BlockSpec((B, tn), lambda n, k: (0, n))
    scratch = [pltpu.VMEM((B, tn), jnp.float32)]           # f32 accumulator

    cparams = pltpu.CompilerParams(
        dimension_semantics=("parallel", "arbitrary"),
        vmem_limit_bytes=32 * 1024 * 1024,   # safe on v5e (16M default) .. v7x (64M phys)
    )

    if float(mask) == 0.0:
        # Fast path: stochastic update is multiplied by mask == 0, so the whole
        # PRNG/binarization path (and its random stream) is skipped entirely.
        cost = pl.CostEstimate(
            flops=2 * B * N * K,
            transcendentals=0,
            bytes_accessed=(2 * N * K + B * K + B * N) * 4,
        )
        return pl.pallas_call(
            _bat_linear_plain_kernel,
            out_shape=jax.ShapeDtypeStruct((B, N), jnp.float32),
            grid=grid,
            in_specs=[x_spec, wk_spec, wk_spec],
            out_specs=out_spec,
            scratch_shapes=scratch,
            compiler_params=cparams,
            cost_estimate=cost,
        )(x, wT, uT)

    # Stochastic path: uniform [0,1) per update element, laid out as (K, N).
    if rand is None:
        if key is None:
            key = jax.random.PRNGKey(0)
        rand = jax.random.uniform(key, (K, N), dtype=jnp.float32)
    assert rand.shape == (K, N)

    # Scalar alpha math (exp/clamp) done once here in f32; the kernel receives
    # alpha, 0.5/alpha and mask via SMEM (avoids a per-tile scalar exp and the
    # per-element divide).
    alpha = jnp.clip(
        jnp.asarray(alpha0, jnp.float32)
        * jnp.exp(jnp.asarray(rho, jnp.float32) * jnp.asarray(alpha_param, jnp.float32)),
        0.0005, 0.05)
    scalars = jnp.stack(
        [alpha, jnp.float32(0.5) / alpha, jnp.asarray(mask, jnp.float32)]
    ).astype(jnp.float32)

    cost = pl.CostEstimate(
        flops=2 * B * N * K,
        transcendentals=0,
        bytes_accessed=(3 * N * K + B * K + B * N) * 4,
    )
    return pl.pallas_call(
        _bat_linear_quant_kernel,
        out_shape=jax.ShapeDtypeStruct((B, N), jnp.float32),
        grid=grid,
        in_specs=[
            pl.BlockSpec(memory_space=pltpu.MemorySpace.SMEM),   # scalars
            x_spec, wk_spec, wk_spec, wk_spec,                   # x, W^T, U^T, rand
        ],
        out_specs=out_spec,
        scratch_shapes=scratch,
        compiler_params=cparams,
        cost_estimate=cost,
    )(scalars, x, wT, uT, rand)


if __name__ == "__main__":
    # Small shapes consistent with nn.Linear(in_features=512, out_features=256),
    # batch of 8.  Tile sizes 128 give a (2, 4) grid so the pipelining is exercised.
    B, IN, OUT = 8, 512, 256

    key = jax.random.PRNGKey(0)
    k_x, k_w, k_u, k_r = jax.random.split(key, 4)

    x = jax.random.normal(k_x, (B, IN), dtype=jnp.float32)
    # weight ~ N(0, 0.01) as in nn.init.normal_(weight, mean=0, std=0.01)
    weight = 0.01 * jax.random.normal(k_w, (OUT, IN), dtype=jnp.float32)
    # update: small values to exercise the quantization path
    update = 0.005 * jax.random.normal(k_u, (OUT, IN), dtype=jnp.float32)

    # Module defaults: alpha=0.0, rho=0.0, alpha0=0.01, mask=0.0
    alpha0, rho, alpha_param = 0.01, 0.0, 0.0

    # ---- mask = 0.0 (module default): deterministic fast path ----
    out = bat_linear_forward(x, weight, update, alpha0, rho, alpha_param, 0.0,
                             tn=128, tk=128)
    out = jax.block_until_ready(out)
    assert out.shape == (B, OUT)
    ref = x @ (weight + update).T
    # bf16 matmul with f32 accumulation vs f32 reference -> tolerance-based check.
    assert jnp.allclose(out, ref, atol=1e-2, rtol=1e-2), "mask=0 path mismatch"

    # ---- mask = 1.0: stochastic binarized-update path ----
    rand_kn = jax.random.uniform(k_r, (IN, OUT), dtype=jnp.float32)
    out_q = bat_linear_forward(x, weight, update, alpha0, rho, alpha_param, 1.0,
                               rand=rand_kn, tn=128, tk=128)
    out_q = jax.block_until_ready(out_q)
    assert jnp.all(jnp.isfinite(out_q))

    # Pure-JAX reference of the stochastic path using the same uniforms.
    alpha_ref = jnp.clip(jnp.float32(alpha0) * jnp.exp(jnp.float32(rho) * jnp.float32(alpha_param)),
                         0.0005, 0.05)
    inv2a_ref = jnp.float32(0.5) / alpha_ref
    x_int_ref = jnp.clip(jnp.floor(update * inv2a_ref + (rand_kn.T + 0.5)), 0.0, 1.0)
    u_eff_ref = (2.0 * x_int_ref - 1.0) * alpha_ref
    ref_q = x @ (weight + u_eff_ref).T
    assert jnp.allclose(out_q, ref_q, atol=1e-1, rtol=0.0), "mask=1 path mismatch"

    print("KERNEL_OK")
</pallas_src>

<mosaic_0001>
module attributes {stable_mosaic.version = 11 : i64} {
  func.func @_bat_linear_plain_kernel(%arg0: i32, %arg1: i32, %arg2: memref<8x512xf32, #tpu.memory_space<vmem>>, %arg3: memref<128x128xf32, #tpu.memory_space<vmem>>, %arg4: memref<128x128xf32, #tpu.memory_space<vmem>>, %arg5: memref<8x128xf32, #tpu.memory_space<vmem>>, %arg6: memref<8x128xf32, #tpu.memory_space<vmem>>) attributes {dimension_semantics = [#tpu.dimension_semantics<parallel>, #tpu.dimension_semantics<arbitrary>], iteration_bounds = array<i64: 2, 4>, scalar_prefetch = 0 : i64, scratch_operands = 1 : i64, tpu.core_type = #tpu.core_type<tc>, window_params = [{pipeline_mode = #tpu.pipeline_mode<synchronous>, transform_indices = @transform_0, window_bounds = array<i64: 8, 512>}, {transform_indices = @transform_1, window_bounds = array<i64: 128, 128>}, {transform_indices = @transform_2, window_bounds = array<i64: 128, 128>}, {transform_indices = @transform_3, window_bounds = array<i64: 8, 128>}]} {
    %c0_i32 = arith.constant 0 : i32
    %0 = arith.cmpi eq, %arg1, %c0_i32 : i32
    %1 = arith.extui %0 : i1 to i32
    %c0_i32_0 = arith.constant 0 : i32
    %2 = arith.cmpi ne, %1, %c0_i32_0 : i32
    scf.if %2 {
      %cst_10 = arith.constant 0.000000e+00 : f32
      %18 = vector.broadcast %cst_10 : f32 to vector<8x128xf32>
      %c0_11 = arith.constant 0 : index
      %c0_12 = arith.constant 0 : index
      %19 = vector.load %arg6[%c0_11, %c0_12] : memref<8x128xf32, #tpu.memory_space<vmem>>, vector<8x128xf32>
      tpu.vector_store %arg6[%c0_11, %c0_12], %18 {strides = array<i32>} : memref<8x128xf32, #tpu.memory_space<vmem>>, vector<8x128xf32>,
    } else {
    }
    %c0 = arith.constant 0 : index
    %c0_1 = arith.constant 0 : index
    %3 = vector.load %arg3[%c0, %c0_1] : memref<128x128xf32, #tpu.memory_space<vmem>>, vector<128x128xf32>
    %c0_2 = arith.constant 0 : index
    %c0_3 = arith.constant 0 : index
    %4 = vector.load %arg4[%c0_2, %c0_3] : memref<128x128xf32, #tpu.memory_space<vmem>>, vector<128x128xf32>
    %5 = arith.addf %3, %4 : vector<128x128xf32>
    %6 = arith.truncf %5 : vector<128x128xf32> to vector<128x128xbf16>
    %c128_i32 = arith.constant 128 : i32
    %7 = arith.muli %arg1, %c128_i32 : i32
    %c0_4 = arith.constant 0 : index
    %8 = arith.index_cast %7 : i32 to index
    %9 = vector.load %arg2[%c0_4, %8] : memref<8x512xf32, #tpu.memory_space<vmem>>, vector<8x128xf32>
    %10 = arith.truncf %9 : vector<8x128xf32> to vector<8x128xbf16>
    %c0_5 = arith.constant 0 : index
    %c0_6 = arith.constant 0 : index
    %11 = vector.load %arg6[%c0_5, %c0_6] : memref<8x128xf32, #tpu.memory_space<vmem>>, vector<8x128xf32>
    %cst = arith.constant dense<0.000000e+00> : vector<8x128xf32>
    %12 = tpu.matmul %10, %6, %cst {dimension_numbers = #tpu.dot_dimension_numbers<[1], [0], [0], [1], [0, 0, 1, 1], [], []>} : vector<8x128xbf16>, vector<128x128xbf16>, vector<8x128xf32> -> vector<8x128xf32>
    %13 = arith.addf %11, %12 : vector<8x128xf32>
    %c0_7 = arith.constant 0 : index
    %c0_8 = arith.constant 0 : index
    %14 = vector.load %arg6[%c0_7, %c0_8] : memref<8x128xf32, #tpu.memory_space<vmem>>, vector<8x128xf32>
    tpu.vector_store %arg6[%c0_7, %c0_8], %13 {strides = array<i32>} : memref<8x128xf32, #tpu.memory_space<vmem>>, vector<8x128xf32>,
    %c3_i32 = arith.constant 3 : i32
    %15 = arith.cmpi eq, %arg1, %c3_i32 : i32
    %16 = arith.extui %15 : i1 to i32
    %c0_i32_9 = arith.constant 0 : i32
    %17 = arith.cmpi ne, %16, %c0_i32_9 : i32
    scf.if %17 {
      %c0_10 = arith.constant 0 : index
      %c0_11 = arith.constant 0 : index
      %18 = vector.load %arg6[%c0_10, %c0_11] : memref<8x128xf32, #tpu.memory_space<vmem>>, vector<8x128xf32>
      %c0_12 = arith.constant 0 : index
      %c0_13 = arith.constant 0 : index
      %19 = vector.load %arg5[%c0_12, %c0_13] : memref<8x128xf32, #tpu.memory_space<vmem>>, vector<8x128xf32>
      tpu.vector_store %arg5[%c0_12, %c0_13], %18 {strides = array<i32>} : memref<8x128xf32, #tpu.memory_space<vmem>>, vector<8x128xf32>,
    } else {
    }
    return
  }
  func.func @transform_0(%arg0: i32, %arg1: i32) -> (i32, i32) {
    %c0_i32 = arith.constant 0 : i32
    %c0_i32_0 = arith.constant 0 : i32
    %c0_i32_1 = arith.constant 0 : i32
    return %c0_i32, %c0_i32_0 : i32, i32
  }
  func.func @transform_1(%arg0: i32, %arg1: i32) -> (i32, i32) {
    %c0_i32 = arith.constant 0 : i32
    return %arg1, %arg0 : i32, i32
  }
  func.func @transform_2(%arg0: i32, %arg1: i32) -> (i32, i32) {
    %c0_i32 = arith.constant 0 : i32
    return %arg1, %arg0 : i32, i32
  }
  func.func @transform_3(%arg0: i32, %arg1: i32) -> (i32, i32) {
    %c0_i32 = arith.constant 0 : i32
    %c0_i32_0 = arith.constant 0 : i32
    return %c0_i32, %arg0 : i32, i32
  }
}

</mosaic_0001>

<bundles_post_ra>
// kernel: tpu_custom_call.1
= control target key start
LH: loop header
LB: loop body
LE: loop exit
PB: predicated region body
PF: predicated region fallthrough
CT: control target
= control target key end

     0   :  { %s1153_s0 = inlined_call_operand.hbm [shape: f32[8,512], index: 0, kind: input, shape index: {}]   ;;  %s1154_s1 = inlined_call_operand.hbm [shape: f32[512,256], index: 1, kind: input, shape index: {}]   ;;  %s1155_s2 = inlined_call_operand.hbm [shape: f32[512,256], index: 2, kind: input, shape index: {}]   ;;  %s1156_s3 = inlined_call_operand.hbm [shape: f32[8,256], index: 3, kind: output, shape index: {}]  }
   0x1   :  { %1160 = sst [smem:[#allocation16_spill]] %s1154_s1 }
   0x2   :  { %8 = vsyncpa [#allocation4], 0 }
   0x3   :  { %9 = vsyncpa [#allocation7], 0 }
   0x4   :  { %11 = vsyncpa [#allocation7 + $0x1], 0 }
   0x5   :  { %12 = vsyncpa [#allocation5], 0 }
   0x6   :  { %14 = vsyncpa [#allocation5 + $0x1], 0  ;;  %s885_s12 = smov 0   ;;  %s887_s13 = smov 0  }
   0x7   :  { %s889_s14 = smov 0   ;;  %s891_s15 = smov 0  }
   0x8   :  { %s893_s16 = smov 0   ;;  %s895_s17 = smov 0  }
   0x9   :  { %s897_s18 = smov 0   ;;  %s899_s19 = smov 0  }
   0xa   :  { %s901_s20 = smov 0   ;;  %s903_s21 = smov 0  }
   0xb   :  { %s905_s22 = smov 0  }
   0xc LB: > { %1161 = sst [smem:[#allocation13_spill]] %s854_s21  ;;  %s29_s23 = sadd.s32 1, %s850_s20  ;;  %s858_s22 = sphi %s905_s22, %s20_s22   ;;  %s854_s21 = sphi %s903_s21, %s1181_s21   ;;  %s850_s20 = sphi %s901_s20, %s1180_s20   ;;  %s846_s19 = sphi %s899_s19, %s1170_s19   ;;  %s842_s18 = sphi %s897_s18, %s1179_s18   ;;  %s838_s17 = sphi %s895_s17, %s1178_s17   ;;  %s834_s16 = sphi %s893_s16, %s1177_s16   ;;  %s830_s15 = sphi %s891_s15, %s1176_s15   ;;  %s826_s14 = sphi %s889_s14, %s1175_s14   ;;  %s822_s13 = sphi %s887_s13, %s1174_s13   ;;  %s818_s12 = sphi %s885_s12, %s1173_s12  }
   0xd   : > { %p30_p0 = scmp.ge.s32.totalorder %s29_s23, 4  ;;  %s32_s24 = sadd.s32 1, %s854_s21 }
   0xe   : > { %p69_p1 = scmp.ne.s32.totalorder %s838_s17, %s834_s16  ;;  %p70_p2 = scmp.eq.s32.totalorder %s858_s22, 0 }
   0xf   : > { %s1183_s23 = smov (%p30_p0, %s29_s23), 0  ;;  %s1185_s24 = smov (!%p30_p0, %s32_s24), %s854_s21 }
  0x10   : > { %1162 = sst [smem:[#allocation14_spill]] %s1183_s23  ;;  %s57_s25 = ssub.s32 %s850_s20, %s1183_s23 }
  0x11   : > { %s62_s26 = sadd.s32 1, %s838_s17  ;;  %p34_p3 = scmp.ge.s32.totalorder %s1185_s24, 2 }
  0x12   : > { %p951_p4 = por %p70_p2, %p69_p1  ;;  %s165_s28 = sand.u32 1, %s858_s22  }
  0x13   : > { %s1187_s24 = smov (%p34_p3, %s1185_s24), 0  ;;  %p546_p5 = scmp.lt.s32.totalorder %s858_s22, 8 }
  0x14   : > { %1164 = sst [smem:[#allocation15_spill]] %s1187_s24  ;;  %s167_s29 = sand.u32 1, %s838_s17  }
  0x15   : > { %s962_s30 = ssub.s32 %s854_s21, %s1187_s24  ;;  %s497_s4 = sshll.u32 %s167_s29, 7 }
  0x16   : > { %s59_s5 = sor.u32 %s962_s30, %s57_s25  ;;  %s518_s6 = sshll.u32 %s850_s20, 5 }
  0x17   : > { %p60_p6 = scmp.eq.s32.totalorder %s59_s5, 0  ;;  %s169_s7 = scalar_lea.vmem [#allocation6], %s497_s4 }
  0x18   : > { %s179_s8 = sshll.u32 %s169_s7, 4  ;;  %s174_s10 = sadd.s32 %s854_s21, %s518_s6  ;;  %s180_s8 = int_to_ptr.vmem [resolvable:$true] %s179_s8 }
  0x19   : > { %s967_s9 = scalar_select %p60_p6, %s838_s17, %s62_s26  }
  0x1a   : > { %s500_s11 = sshll.u32 %s174_s10, 3  ;;  %p974_p7 = pnand %p546_p5, %p951_p4 }
  0x1b   : > { %s1166_s1 = sld [smem:[#allocation16_spill]]  ;;  %s981_s5 = scalar_lea.sflag [#allocation7], %s165_s28 }
  0x1c   : > { %s860_s27 = smov 256   ;;  %s861_s6 = smov 128  }
  0x1d   : > { %s862_s7 = smov 8   ;;  %s200_s29 = scalar_lea.hbm %s1155_s2, %s500_s11 }
  0x1e   : > { %s193_s28 = scalar_lea.vmem [#allocation8], %s497_s4  ;;  %p114_p8 = scmp.eq.s32.totalorder %s962_s30, 0 }
  0x1f   : > { %s997_s21 = sadd.s32 4294967295, %s858_s22   ;;  %p75_p9 = scmp.ne.s32.totalorder %s834_s16, %s830_s15 }
  0x20   : > { %p76_p10 = scmp.eq.s32.totalorder %s997_s21, 0  ;;  %p126_p12 = scmp.ne.s32.totalorder %s826_s14, %s822_s13 }
  0x21   : > { %s176_s25 = scalar_lea.hbm %s1166_s1, %s500_s11  ;;  %s201_s1 = sshll.u32 %s200_s29, 4  ;;  %s202_s1 = int_to_ptr.hbm [resolvable:$true] %s201_s1 }
  0x22   : > { %s177_s26 = sshll.u32 %s176_s25, 4  ;;  %s992_s25 = sshll.u32 %s193_s28, 4  ;;  %s178_s26 = int_to_ptr.hbm [resolvable:$true] %s177_s26  ;;  %s204_s25 = int_to_ptr.vmem [resolvable:$true] %s992_s25 }
  0x23   : > { %537 = dma.hbm_to_vmem [thread:$0]  (!%p974_p7), %s178_s26, 2048, %s180_s8, %s981_s5, %s860_s27, %s861_s6, %s862_s7  }
  0x24   : > { %s493_s8 = sadd.s32 4294967294, %s858_s22   ;;  %s116_s26 = sadd.s32 1, %s826_s14 }
  0x25   : > { %s1005_s24 = scalar_select %p114_p8, %s826_s14, %s116_s26  }
  0x26   : > { %p1009_p11 = por %p76_p10, %p75_p9  ;;  %p127_p13 = scmp.eq.s32.totalorder %s997_s21, 7 }
  0x27   : > { %p132_p0 = scmp.ne.s32.totalorder %s822_s13, %s818_s12  ;;  %p133_p1 = scmp.eq.s32.totalorder %s493_s8, 7 }
  0x28   : > { %p494_p2 = scmp.ge.s32.totalorder %s858_s22, 1  ;;  %p1019_p3 = por %p127_p13, %p126_p12 }
  0x29   : > { %p140_p4 = scmp.lt.s32.totalorder %s858_s22, 9  ;;  %p1024_p5 = por %p133_p1, %p132_p0 }
  0x2a   : > { %s152_s29 = sshll.u32 %s1153_s0, 4  ;;  %s863_s28 = smov [#allocation3]   ;;  %s153_s29 = int_to_ptr.hbm [resolvable:$true] %s152_s29 }
  0x2b   : > { %p141_p6 = pnand %p494_p2, %p140_p4  ;;  %s154_s26 = sshll.u32 %s863_s28, 4  ;;  %s155_s26 = int_to_ptr.vmem [resolvable:$true] %s154_s26 }
  0x2c   : > { %540 = dma.hbm_to_vmem [thread:$0]  (!%p974_p7), %s202_s1, 2048, %s204_s25, %s981_s5, %s860_s27, %s861_s6, %s862_s7  }
  0x2d   : > { %p530_p8 = pneg %p141_p6  ;;  %215 = sbr.rel (%p141_p6) target bundleno = 254 (0xfe), region = 32 }
  0x2f   : > { %p531_p9 = pnand %p530_p8, %p76_p10 }
  0x31   : > { %533 = dma.hbm_to_vmem [thread:$0]  (!%p531_p9), %s153_s29, 512, %s155_s26, [#allocation4]  }
  0x32   : > { %805 = dma.done.wait (%p76_p10), [#allocation4], 512  }
  0x33   : > { %807 = vsyncadd (%p76_p10), [#allocation4], 4294966784  ;;  %s222_s8 = sand.u32 1, %s997_s21   ;;  %s224_s11 = sand.u32 1, %s834_s16  }
  0x34   : > { %s507_s10 = sshll.u32 %s224_s11, 7  ;;  %s223_s23 = scalar_lea.sflag [#allocation7], %s222_s8 }
  0x35   : > { %s1047_s28 = scalar_lea.vmem [#allocation6], %s507_s10 }
  0x36   : > { %809 = dma.done.wait (%p1009_p11), %s223_s23, 4096  }
  0x37   : > { %811 = vsyncadd (%p1009_p11), %s223_s23, 4294963200  ;;  %s262_s1 = sand.u32 1, %s822_s13   ;;  %s1058_s27 = scalar_lea.vmem [#allocation8], %s507_s10 }
  0x38   : > { %s1056_s5 = sshll.u32 %s262_s1, 3  ;;  %p510_p7 = scmp.ne.s32.totalorder %s842_s18, 0 }
  0x39   : > { %s264_s21 = scalar_lea.vmem [#allocation9], %s1056_s5 }
  0x3a   : > { %270 = sbr.rel (%p510_p7) target bundleno = 65 (0x41), region = 48 }
  0x3f   : > { %v864_v0 = vmov 0.0  }
  0x40   : > { %271 = vst [vmem:[#allocation2] sm:$0xff] %v864_v0 }
  0x41 PF: > { %v286_v1 = vld [vmem:[%s1047_s28 + $0x70] sm:$0xff]  ;;  %v287_v2 = vld [vmem:[%s1047_s28 + $0x78] sm:$0xff]  ;;  %v284_v6 = vld [vmem:[%s1047_s28 + $0x60] sm:$0xff]  ;;  %s511_s6 = sshll.u32 %s842_s18, 7  ;;  %p513_p10 = scmp.ne.s32.totalorder %s842_s18, 3 }
  0x42   : > { %v302_v3 = vld [vmem:[%s1058_s27 + $0x70] sm:$0xff]  ;;  %v303_v4 = vld [vmem:[%s1058_s27 + $0x78] sm:$0xff]  ;;  %v285_v7 = vld [vmem:[%s1047_s28 + $0x68] sm:$0xff]  ;;  %s329_s7 = sshra.s32 %s511_s6, 7 }
  0x43   : > { %v318_v5 = vadd.f32 %v302_v3, %v286_v1  ;;  %v319_v8 = vadd.f32 %v303_v4, %v287_v2  ;;  %v300_v9 = vld [vmem:[%s1058_s27 + $0x60] sm:$0xff]  ;;  %v301_v10 = vld [vmem:[%s1058_s27 + $0x68] sm:$0xff]  ;;  %v282_v11 = vld [vmem:[%s1047_s28 + $0x50] sm:$0xff]  ;;  %s512_s25 = sshll.u32 %s329_s7, 3 }
  0x44   : > { %v316_v12 = vadd.f32 %v300_v9, %v284_v6  ;;  %v317_v13 = vadd.f32 %v301_v10, %v285_v7  ;;  %v283_v14 = vld [vmem:[%s1047_s28 + $0x58] sm:$0xff]  ;;  %v298_v15 = vld [vmem:[%s1058_s27 + $0x50] sm:$0xff]  ;;  %v280_v21 = vld [vmem:[%s1047_s28 + $0x40] sm:$0xff]  ;;  %s332_s4 = scalar_lea.vmem [#allocation3], %s512_s25 }
  0x45   : > { %v299_v16 = vld [vmem:[%s1058_s27 + $0x58] sm:$0xff]  ;;  %v327_v17 = vpack.c.bf16 %v319_v8, %v318_v5  ;;  %v314_v19 = vadd.f32 %v298_v15, %v282_v11  ;;  %v281_v22 = vld [vmem:[%s1047_s28 + $0x48] sm:$0xff]  ;;  %v296_v23 = vld [vmem:[%s1058_s27 + $0x40] sm:$0xff] }
  0x46   : > { %v326_v18 = vpack.c.bf16 %v317_v13, %v316_v12  ;;  %v315_v20 = vadd.f32 %v299_v16, %v283_v14  ;;  %v297_v24 = vld [vmem:[%s1058_s27 + $0x48] sm:$0xff]  ;;  %v312_v26 = vadd.f32 %v296_v23, %v280_v21  ;;  %v278_v28 = vld [vmem:[%s1047_s28 + $0x30] sm:$0xff]  ;;  %v279_v29 = vld [vmem:[%s1047_s28 + $0x38] sm:$0xff] }
  0x47   : > { %336 = vmatpush.bf16.msra.mxu0 %v327_v17  ;;  %v313_v27 = vadd.f32 %v297_v24, %v281_v22  ;;  %v294_v30 = vld [vmem:[%s1058_s27 + $0x30] sm:$0xff]  ;;  %v295_v31 = vld [vmem:[%s1058_s27 + $0x38] sm:$0xff]  ;;  %v276_v35 = vld [vmem:[%s1047_s28 + $0x20] sm:$0xff] }
  0x48   : > { %v325_v25 = vpack.c.bf16 %v315_v20, %v314_v19  ;;  %v310_v33 = vadd.f32 %v294_v30, %v278_v28  ;;  %v311_v34 = vadd.f32 %v295_v31, %v279_v29  ;;  %v277_v36 = vld [vmem:[%s1047_s28 + $0x28] sm:$0xff]  ;;  %v292_v37 = vld [vmem:[%s1058_s27 + $0x20] sm:$0xff]  ;;  %v274_v42 = vld [vmem:[%s1047_s28 + $0x10] sm:$0xff] }
  0x49   : > { %v324_v32 = vpack.c.bf16 %v313_v27, %v312_v26  ;;  %v293_v38 = vld [vmem:[%s1058_s27 + $0x28] sm:$0xff]  ;;  %v308_v40 = vadd.f32 %v292_v37, %v276_v35  ;;  %v275_v43 = vld [vmem:[%s1047_s28 + $0x18] sm:$0xff]  ;;  %v290_v44 = vld [vmem:[%s1058_s27 + $0x10] sm:$0xff] }
  0x4a   : > { %v323_v39 = vpack.c.bf16 %v311_v34, %v310_v33  ;;  %v309_v41 = vadd.f32 %v293_v38, %v277_v36  ;;  %v291_v45 = vld [vmem:[%s1058_s27 + $0x18] sm:$0xff]  ;;  %v306_v47 = vadd.f32 %v290_v44, %v274_v42  ;;  %v272_v49 = vld [vmem:[%s1047_s28] sm:$0xff]  ;;  %v273_v50 = vld [vmem:[%s1047_s28 + $0x8] sm:$0xff] }
  0x4b   : > { %337 = vmatpush.bf16.msra.mxu0 %v326_v18  ;;  %v307_v48 = vadd.f32 %v291_v45, %v275_v43  ;;  %v288_v51 = vld [vmem:[%s1058_s27] sm:$0xff]  ;;  %v289_v52 = vld [vmem:[%s1058_s27 + $0x8] sm:$0xff]  ;;  %v333_v57 = vld [vmem:[%s332_s4] sm:$0xff] }
  0x4c   : > { %v322_v46 = vpack.c.bf16 %v309_v41, %v308_v40  ;;  %v304_v54 = vadd.f32 %v288_v51, %v272_v49  ;;  %v305_v55 = vadd.f32 %v289_v52, %v273_v50  ;;  %v334_v58 = vpack.c.bf16 %v333_v57, %v333_v57  ;;  %v335_v59 = vld [vmem:[#allocation2] sm:$0xff] }
  0x4d   : > { %v321_v53 = vpack.c.bf16 %v307_v48, %v306_v47 }
  0x4e   : > { %v320_v56 = vpack.c.bf16 %v305_v55, %v304_v54 }
  0x4f   : > { %338 = vmatpush.bf16.msra.mxu0 %v325_v25 }
  0x53   : > { %339 = vmatpush.bf16.msra.mxu0 %v324_v32 }
  0x57   : > { %340 = vmatpush.bf16.msra.mxu0 %v323_v39 }
  0x5b   : > { %341 = vmatpush.bf16.msra.mxu0 %v322_v46 }
  0x5f   : > { %342 = vmatpush.bf16.msra.mxu0 %v321_v53 }
  0x63   : > { %343 = vmatpush.bf16.msra.mxu0 %v320_v56 }
  0x66   : > { %344 = vmatmul.bf16.vlgmr.msra.gmra.mxu0 %v334_v58 }
  0xe3   : > { %v345_v60 = vpop.f32.mrf.mxu0 }
  0xe4   : > { %v349_v61 = vadd.f32 %v345_v60, %v335_v59 }
  0xe6   : > { %350 = vst [vmem:[#allocation2] sm:$0xff] %v349_v61 }
  0xe7   : > { %354 = sbr.rel (%p513_p10) target bundleno = 239 (0xef), region = 52 }
  0xeb   : > { %v347_v62 = vpop.f32.mrf.mxu0 }
  0xed   : > { %v355_v63 = vld [vmem:[#allocation2] sm:$0xff] }
  0xee   : > { %356 = vst [vmem:[%s264_s21] sm:$0xff] %v355_v63 }
  0xef PF: > { %s515_s29 = sshll.u32 %s846_s19, 3  ;;  %s370_s10 = sshll.u32 %s264_s21, 4  ;;  %s371_s10 = int_to_ptr.vmem [resolvable:$true] %s370_s10 }
  0xf0   : > { %s368_s11 = scalar_lea.hbm %s1156_s3, %s515_s29  ;;  %s358_s18 = scalar_lea.sflag [#allocation5], %s262_s1 }
  0xf1   : > { %s372_s23 = sshll.u32 %s368_s11, 4  ;;  %s752_s7 = scalar_lea.hbm %s1156_s3, 16  ;;  %s373_s23 = int_to_ptr.hbm [resolvable:$true] %s372_s23 }
  0xf2   : > { %s746_s28 = sshra.s32 %s373_s23, 4  ;;  %s747_s28 = int_to_ptr.hbm [resolvable:$true] %s746_s28 }
  0xf3   : > { %s748_s27 = scalar_lea.hbm %s747_s28, 8  ;;  %p753_p0 = scmp.lt.s32.totalorder %s747_s28, %s1156_s3 }
  0xf4   : > { %p749_p11 = scmp.ne.s32.totalorder %s747_s28, %s748_s27  ;;  %p754_p1 = scmp.lt.s32.totalorder %s752_s7, %s748_s27 }
  0xf6   : > { %p750_p12 = pnand %p749_p11, %p1019_p3  ;;  %p755_p2 = por %p754_p1, %p753_p0 }
  0xf8   : > { %p751_p13 = pneg %p750_p12 }
  0xfa   : > { %p756_p4 = pnand %p755_p2, %p751_p13 }
  0xfc   : > { %759 = shalt.err (!%p756_p4)
}
  0xfd   : > { %528 = dma.vmem_to_hbm [thread:$0]  (%p1019_p3), %s371_s10, 128, %s373_s23, %s358_s18  }
  0xfe PF: > { %p548_p6 = scmp.ge.s32.totalorder %s858_s22, 2  ;;  %s384_s1 = sand.u32 1, %s818_s12  }
  0xff   : > { %s385_s5 = scalar_lea.sflag [#allocation5], %s384_s1 }
 0x100   : > { %p542_p8 = pnand %p548_p6, %p1024_p5 }
 0x102   : > { %p543_p9 = pneg %p542_p8 }
 0x104   : > { %813 = dma.done.wait (%p543_p9), %s385_s5, 128  }
 0x105   : > { %815 = vsyncadd (%p543_p9), %s385_s5, 4294967168  ;;  %s20_s22 = sadd.s32 1, %s858_s22   ;;  %s1170_s19 = sld [smem:[#allocation13_spill]] }
 0x106   : > { %p17_p7 = scmp.ge.s32.totalorder %s20_s22, 10   ;;  %s1171_s21 = sld [smem:[#allocation14_spill]] }
 0x107   : > { %s1172_s29 = sld [smem:[#allocation15_spill]]  ;;  %s1173_s12 = smov %s822_s13 }
 0x108   : > { %s1174_s13 = smov %s826_s14  ;;  %s1175_s14 = smov %s1005_s24 }
 0x109   : > { %s1176_s15 = smov %s834_s16  ;;  %s1177_s16 = smov %s838_s17 }
 0x10a   : > { %s1178_s17 = smov %s967_s9  ;;  %s1179_s18 = smov %s850_s20 }
 0x10b   :  { %19 = sbr.rel (!%p17_p7) target bundleno = 12 (0xc), region = 102 }
 0x10c   : > { %s1180_s20 = smov %s1171_s21 }
 0x10d   : > { %s1181_s21 = smov %s1172_s29 }
 0x110   :  { %391 = vsyncpa [#allocation4], 1 }
 0x111   :  { %393 = vsyncpa [#allocation4 + $0x1], 1 }
 0x112   :  { %394 = vsyncpa [#allocation7], 1 }
 0x113   :  { %396 = vsyncpa [#allocation7 + $0x1], 1 }
 0x114   :  { %397 = vsyncpa [#allocation5], 1 }
 0x115   :  { %399 = vsyncpa [#allocation5 + $0x1], 1 }

</bundles_post_ra>
